<compile_context>
chip_gen: v5e
topology: v5e:2x2
jax: 0.10.0
libtpu: 0.0.40
codegen_flags: <defaults>
</compile_context>

<pallas_src>
import functools

import jax
import jax.numpy as jnp
from jax.experimental import pallas as pl
from jax.experimental.pallas import tpu as pltpu

SIGMA_MIN = 0.002
SIGMA_MAX = 80.0

LANE = 128
SUBLANE = 8


def _round_up(n, m):
    return ((n + m - 1) // m) * m


def _pad2(a, rows, cols):
    """Zero-pad a 2-D array up to (rows, cols)."""
    pr, pc = rows - a.shape[0], cols - a.shape[1]
    if pr == 0 and pc == 0:
        return a
    return jnp.pad(a, ((0, pr), (0, pc)))


def consistency_kernel(skip_ref,   # VMEM (TM, 1)  f32  per-row skip scaling
                       out_sc_ref, # VMEM (TM, 1)  f32  per-row out scaling
                       x_ref,      # VMEM (TM, Dp) f32
                       temb_ref,   # VMEM (TM, Hp) f32  (emb[t] + b1, per row)
                       w1_ref,     # VMEM (Dp, Hp) bf16
                       w2_ref,     # VMEM (Hp, Dp) bf16
                       b2_ref,     # VMEM (1,  Dp) f32
                       o_ref):     # VMEM (TM, Dp) f32
    x = x_ref[...]                                               # (TM, Dp) f32

    # base_model(x, t): 2-layer MLP + additive timestep embedding.
    h = jnp.dot(x.astype(w1_ref.dtype), w1_ref[...],
                preferred_element_type=jnp.float32)              # (TM, Hp) f32
    h = h + temb_ref[...]                                        # b1 pre-fused
    h = jax.nn.gelu(h)                                           # f32 elementwise
    model_out = jnp.dot(h.astype(w2_ref.dtype), w2_ref[...],
                        preferred_element_type=jnp.float32)      # (TM, Dp) f32
    model_out = model_out + b2_ref[...]

    # consistency boundary condition: skip * x + out * model_out
    o_ref[...] = skip_ref[...] * x + out_sc_ref[...] * model_out


def consistency_forward(x, sigma, params, *, tm=256):
    """x: (B, L, D) f32, sigma: (B,) f32 -> (B, L, D) f32."""
    B, L, D = x.shape
    H = params["w1"].shape[1]
    Dp = _round_up(D, LANE)
    Hp = _round_up(H, LANE)

    M = B * L
    TM = min(tm, _round_up(M, SUBLANE))
    num_tiles = pl.cdiv(M, TM)
    Mp = num_tiles * TM

    # --- hoisted scalar / gather glue (cheap, per-batch) -------------------
    # sigma -> timestep (matches torch .long() truncation for positive sigma)
    t = (sigma / SIGMA_MAX * 999.0).astype(jnp.int32)            # (B,)
    temb_b = params["emb"][t] + params["b1"]                     # (B, H), b1 fused
    inv = jax.lax.rsqrt(sigma * sigma + SIGMA_MIN * SIGMA_MIN)
    skip_b = SIGMA_MIN * inv                                     # (B,)
    out_b = sigma * SIGMA_MIN * inv                              # (B,)

    # --- flatten (B, L, .) -> (B*L, .) rows, pad to tile / lane multiples --
    x2 = _pad2(x.reshape(M, D), Mp, Dp)
    temb_rows = _pad2(
        jnp.broadcast_to(temb_b[:, None, :], (B, L, H)).reshape(M, H), Mp, Hp)
    skip_rows = _pad2(jnp.broadcast_to(skip_b[:, None], (B, L)).reshape(M, 1), Mp, 1)
    out_rows = _pad2(jnp.broadcast_to(out_b[:, None], (B, L)).reshape(M, 1), Mp, 1)

    w1 = _pad2(params["w1"], Dp, Hp).astype(jnp.bfloat16)
    w2 = _pad2(params["w2"], Hp, Dp).astype(jnp.bfloat16)
    b2 = _pad2(params["b2"], 1, Dp)

    # TODO(synk): for very large D/H on v7x (64 MiB VMEM), tile the H/K axis with
    # an "arbitrary" grid dim + f32 accumulator scratch instead of keeping both
    # full weights resident.
    out = pl.pallas_call(
        consistency_kernel,
        out_shape=jax.ShapeDtypeStruct((Mp, Dp), jnp.float32),
        grid_spec=pltpu.PrefetchScalarGridSpec(
            num_scalar_prefetch=0,
            grid=(num_tiles,),
            in_specs=[
                pl.BlockSpec((TM, 1), lambda i: (i, 0)),    # skip
                pl.BlockSpec((TM, 1), lambda i: (i, 0)),    # out scaling
                pl.BlockSpec((TM, Dp), lambda i: (i, 0)),   # x rows
                pl.BlockSpec((TM, Hp), lambda i: (i, 0)),   # temb rows
                pl.BlockSpec((Dp, Hp), lambda i: (0, 0)),   # w1 (resident)
                pl.BlockSpec((Hp, Dp), lambda i: (0, 0)),   # w2 (resident)
                pl.BlockSpec((1, Dp), lambda i: (0, 0)),    # b2 (resident)
            ],
            out_specs=pl.BlockSpec((TM, Dp), lambda i: (i, 0)),
        ),
        compiler_params=pltpu.CompilerParams(
            dimension_semantics=("parallel",),
            vmem_limit_bytes=64 * 1024 * 1024,
        ),
    )(skip_rows, out_rows, x2, temb_rows, w1, w2, b2)

    return out[:M, :D].reshape(B, L, D)


def consistency_forward_ref(x, sigma, params):
    """Pure-JAX reference (same bf16 weight cast) for verification."""
    t = (sigma / SIGMA_MAX * 999.0).astype(jnp.int32)
    temb = params["emb"][t] + params["b1"]                       # (B, H)
    w1 = params["w1"].astype(jnp.bfloat16)
    w2 = params["w2"].astype(jnp.bfloat16)

    h = jnp.einsum("bld,dh->blh", x.astype(jnp.bfloat16), w1,
                   preferred_element_type=jnp.float32) + temb[:, None, :]
    h = jax.nn.gelu(h)
    model_out = jnp.einsum("blh,hd->bld", h.astype(jnp.bfloat16), w2,
                           preferred_element_type=jnp.float32) + params["b2"]

    inv = jax.lax.rsqrt(sigma * sigma + SIGMA_MIN * SIGMA_MIN)
    skip_scaling = (SIGMA_MIN * inv)[:, None, None]
    out_scaling = (sigma * SIGMA_MIN * inv)[:, None, None]
    return skip_scaling * x + out_scaling * model_out


def init_params(key, D, H, n_timesteps=1000):
    k1, k2, k3 = jax.random.split(key, 3)
    return {
        "w1": jax.random.normal(k1, (D, H), jnp.float32) / jnp.sqrt(D),
        "b1": jnp.zeros((1, H), jnp.float32),
        "w2": jax.random.normal(k2, (H, D), jnp.float32) / jnp.sqrt(H),
        "b2": jnp.zeros((1, D), jnp.float32),
        "emb": 0.02 * jax.random.normal(k3, (n_timesteps, H), jnp.float32),
    }


if __name__ == "__main__":
    B, L, D, H = 2, 16, 32, 64
    key = jax.random.PRNGKey(0)
    kx, kp = jax.random.split(key, 2)

    x = jax.random.normal(kx, (B, L, D), jnp.float32) * SIGMA_MAX
    # per-batch sigma; include sigma_max (1-step sampling case) + a mid value
    sigma = jnp.array([SIGMA_MAX, 5.0], dtype=jnp.float32)

    params = init_params(kp, D, H)

    out = consistency_forward(x, sigma, params)
    out = jax.block_until_ready(out)

    ref = consistency_forward_ref(x, sigma, params)
    assert out.shape == (B, L, D) and out.dtype == jnp.float32
    assert jnp.allclose(out, ref, rtol=2e-2, atol=2e-2), "mismatch vs reference"

    print("KERNEL_OK")
</pallas_src>

<mosaic_0001>
module attributes {stable_mosaic.version = 11 : i64} {
  func.func @consistency_kernel(%arg0: i32, %arg1: memref<32x1xf32, #tpu.memory_space<vmem>>, %arg2: memref<32x1xf32, #tpu.memory_space<vmem>>, %arg3: memref<32x128xf32, #tpu.memory_space<vmem>>, %arg4: memref<32x128xf32, #tpu.memory_space<vmem>>, %arg5: memref<128x128xbf16, #tpu.memory_space<vmem>>, %arg6: memref<128x128xbf16, #tpu.memory_space<vmem>>, %arg7: memref<1x128xf32, #tpu.memory_space<vmem>>, %arg8: memref<32x128xf32, #tpu.memory_space<vmem>>) attributes {dimension_semantics = [#tpu.dimension_semantics<parallel>], iteration_bounds = array<i64: 1>, scalar_prefetch = 0 : i64, scratch_operands = 0 : i64, tpu.core_type = #tpu.core_type<tc>, window_params = [{transform_indices = @transform_0, window_bounds = array<i64: 32, 1>}, {transform_indices = @transform_1, window_bounds = array<i64: 32, 1>}, {transform_indices = @transform_2, window_bounds = array<i64: 32, 128>}, {transform_indices = @transform_3, window_bounds = array<i64: 32, 128>}, {pipeline_mode = #tpu.pipeline_mode<synchronous>, transform_indices = @transform_4, window_bounds = array<i64: 128, 128>}, {pipeline_mode = #tpu.pipeline_mode<synchronous>, transform_indices = @transform_5, window_bounds = array<i64: 128, 128>}, {pipeline_mode = #tpu.pipeline_mode<synchronous>, transform_indices = @transform_6, window_bounds = array<i64: 1, 128>}, {transform_indices = @transform_7, window_bounds = array<i64: 32, 128>}]} {
    %c0 = arith.constant 0 : index
    %c0_0 = arith.constant 0 : index
    %0 = vector.load %arg3[%c0, %c0_0] : memref<32x128xf32, #tpu.memory_space<vmem>>, vector<32x128xf32>
    %1 = arith.truncf %0 : vector<32x128xf32> to vector<32x128xbf16>
    %c0_1 = arith.constant 0 : index
    %c0_2 = arith.constant 0 : index
    %2 = vector.load %arg5[%c0_1, %c0_2] : memref<128x128xbf16, #tpu.memory_space<vmem>>, vector<128x128xbf16>
    %cst = arith.constant dense<0.000000e+00> : vector<32x128xf32>
    %3 = tpu.matmul %1, %2, %cst {dimension_numbers = #tpu.dot_dimension_numbers<[1], [0], [0], [1], [0, 0, 1, 1], [], []>} : vector<32x128xbf16>, vector<128x128xbf16>, vector<32x128xf32> -> vector<32x128xf32>
    %c0_3 = arith.constant 0 : index
    %c0_4 = arith.constant 0 : index
    %4 = vector.load %arg4[%c0_3, %c0_4] : memref<32x128xf32, #tpu.memory_space<vmem>>, vector<32x128xf32>
    %5 = arith.addf %3, %4 : vector<32x128xf32>
    %6 = arith.mulf %5, %5 : vector<32x128xf32>
    %7 = arith.mulf %5, %6 : vector<32x128xf32>
    %cst_5 = arith.constant 4.471500e-02 : f32
    %8 = vector.broadcast %cst_5 : f32 to vector<32x128xf32>
    %9 = arith.mulf %8, %7 : vector<32x128xf32>
    %10 = arith.addf %5, %9 : vector<32x128xf32>
    %cst_6 = arith.constant 0.797884583 : f32
    %11 = vector.broadcast %cst_6 : f32 to vector<32x128xf32>
    %12 = arith.mulf %11, %10 : vector<32x128xf32>
    %13 = math.tanh %12 : vector<32x128xf32>
    %cst_7 = arith.constant 1.000000e+00 : f32
    %14 = vector.broadcast %cst_7 : f32 to vector<32x128xf32>
    %15 = arith.addf %14, %13 : vector<32x128xf32>
    %cst_8 = arith.constant 5.000000e-01 : f32
    %16 = vector.broadcast %cst_8 : f32 to vector<32x128xf32>
    %17 = arith.mulf %16, %15 : vector<32x128xf32>
    %18 = arith.mulf %5, %17 : vector<32x128xf32>
    %19 = arith.truncf %18 : vector<32x128xf32> to vector<32x128xbf16>
    %c0_9 = arith.constant 0 : index
    %c0_10 = arith.constant 0 : index
    %20 = vector.load %arg6[%c0_9, %c0_10] : memref<128x128xbf16, #tpu.memory_space<vmem>>, vector<128x128xbf16>
    %cst_11 = arith.constant dense<0.000000e+00> : vector<32x128xf32>
    %21 = tpu.matmul %19, %20, %cst_11 {dimension_numbers = #tpu.dot_dimension_numbers<[1], [0], [0], [1], [0, 0, 1, 1], [], []>} : vector<32x128xbf16>, vector<128x128xbf16>, vector<32x128xf32> -> vector<32x128xf32>
    %c0_12 = arith.constant 0 : index
    %c0_13 = arith.constant 0 : index
    %22 = vector.load %arg7[%c0_12, %c0_13] : memref<1x128xf32, #tpu.memory_space<vmem>>, vector<1x128xf32>
    %23 = vector.broadcast %22 : vector<1x128xf32> to vector<32x128xf32>
    %24 = arith.addf %21, %23 : vector<32x128xf32>
    %c0_14 = arith.constant 0 : index
    %c0_15 = arith.constant 0 : index
    %25 = vector.load %arg1[%c0_14, %c0_15] : memref<32x1xf32, #tpu.memory_space<vmem>>, vector<32x1xf32>
    %26 = vector.broadcast %25 : vector<32x1xf32> to vector<32x128xf32>
    %27 = arith.mulf %26, %0 : vector<32x128xf32>
    %c0_16 = arith.constant 0 : index
    %c0_17 = arith.constant 0 : index
    %28 = vector.load %arg2[%c0_16, %c0_17] : memref<32x1xf32, #tpu.memory_space<vmem>>, vector<32x1xf32>
    %29 = vector.broadcast %28 : vector<32x1xf32> to vector<32x128xf32>
    %30 = arith.mulf %29, %24 : vector<32x128xf32>
    %31 = arith.addf %27, %30 : vector<32x128xf32>
    %c0_18 = arith.constant 0 : index
    %c0_19 = arith.constant 0 : index
    %32 = vector.load %arg8[%c0_18, %c0_19] : memref<32x128xf32, #tpu.memory_space<vmem>>, vector<32x128xf32>
    tpu.vector_store %arg8[%c0_18, %c0_19], %31 {strides = array<i32>} : memref<32x128xf32, #tpu.memory_space<vmem>>, vector<32x128xf32>,
    return
  }
  func.func @transform_0(%arg0: i32) -> (i32, i32) {
    %c0_i32 = arith.constant 0 : i32
    %c0_i32_0 = arith.constant 0 : i32
    return %arg0, %c0_i32 : i32, i32
  }
  func.func @transform_1(%arg0: i32) -> (i32, i32) {
    %c0_i32 = arith.constant 0 : i32
    %c0_i32_0 = arith.constant 0 : i32
    return %arg0, %c0_i32 : i32, i32
  }
  func.func @transform_2(%arg0: i32) -> (i32, i32) {
    %c0_i32 = arith.constant 0 : i32
    %c0_i32_0 = arith.constant 0 : i32
    return %arg0, %c0_i32 : i32, i32
  }
  func.func @transform_3(%arg0: i32) -> (i32, i32) {
    %c0_i32 = arith.constant 0 : i32
    %c0_i32_0 = arith.constant 0 : i32
    return %arg0, %c0_i32 : i32, i32
  }
  func.func @transform_4(%arg0: i32) -> (i32, i32) {
    %c0_i32 = arith.constant 0 : i32
    %c0_i32_0 = arith.constant 0 : i32
    %c0_i32_1 = arith.constant 0 : i32
    return %c0_i32, %c0_i32_0 : i32, i32
  }
  func.func @transform_5(%arg0: i32) -> (i32, i32) {
    %c0_i32 = arith.constant 0 : i32
    %c0_i32_0 = arith.constant 0 : i32
    %c0_i32_1 = arith.constant 0 : i32
    return %c0_i32, %c0_i32_0 : i32, i32
  }
  func.func @transform_6(%arg0: i32) -> (i32, i32) {
    %c0_i32 = arith.constant 0 : i32
    %c0_i32_0 = arith.constant 0 : i32
    %c0_i32_1 = arith.constant 0 : i32
    return %c0_i32, %c0_i32_0 : i32, i32
  }
  func.func @transform_7(%arg0: i32) -> (i32, i32) {
    %c0_i32 = arith.constant 0 : i32
    %c0_i32_0 = arith.constant 0 : i32
    return %arg0, %c0_i32 : i32, i32
  }
}

</mosaic_0001>

<bundles_post_ra>
// kernel: tpu_custom_call.1
= control target key start
LH: loop header
LB: loop body
LE: loop exit
PB: predicated region body
PF: predicated region fallthrough
CT: control target
= control target key end

     0   :  { %12 = vsyncpa [#allocation3], 0  ;;  %s732_s0 = inlined_call_operand.vmem [shape: f32[32,1], index: 0, kind: input, shape index: {}]   ;;  %s733_s1 = inlined_call_operand.vmem [shape: f32[32,1], index: 1, kind: input, shape index: {}]   ;;  %s734_s2 = inlined_call_operand.hbm [shape: f32[32,128], index: 2, kind: input, shape index: {}]   ;;  %s735_s3 = inlined_call_operand.hbm [shape: f32[32,128], index: 3, kind: input, shape index: {}]   ;;  %s736_s4 = inlined_call_operand.vmem [shape: bf16[128,128], index: 4, kind: input, shape index: {}]   ;;  %s737_s5 = inlined_call_operand.hbm [shape: bf16[128,128], index: 5, kind: input, shape index: {}]   ;;  %s738_s6 = inlined_call_operand.vmem [shape: f32[1,128], index: 6, kind: input, shape index: {}]   ;;  %s739_s7 = inlined_call_operand.hbm [shape: f32[32,128], index: 7, kind: output, shape index: {}]  }
   0x1   :  { %13 = vsyncpa [#allocation6], 0 }
   0x2   :  { %14 = vsyncpa [#allocation4], 0  ;;  %s36_s26 = sshll.u32 %s735_s3, 4  ;;  %s595_s27 = smov [#allocation5]   ;;  %s37_s26 = int_to_ptr.hbm [resolvable:$true] %s36_s26 }
   0x3   :  { %s38_s28 = sshll.u32 %s595_s27, 4  ;;  %s23_s8 = sshll.u32 %s734_s2, 4  ;;  %s39_s28 = int_to_ptr.vmem [resolvable:$true] %s38_s28  ;;  %s24_s8 = int_to_ptr.hbm [resolvable:$true] %s23_s8 }
   0x4   :  { %s596_s9 = smov 128   ;;  %s597_s10 = smov 8  }
   0x5   :  { %44 = dma.hbm_to_vmem [thread:$0]  %s37_s26, 512, %s39_s28, [#allocation6], %s596_s9, %s596_s9, %s597_s10  }
   0x6   :  { %s598_s11 = smov [#allocation2]   ;;  %s51_s3 = sshll.u32 %s737_s5, 4  ;;  %s52_s3 = int_to_ptr.hbm [resolvable:$true] %s51_s3 }
   0x7   :  { %s25_s12 = sshll.u32 %s598_s11, 4  ;;  %s599_s2 = smov [#allocation7]   ;;  %s26_s12 = int_to_ptr.vmem [resolvable:$true] %s25_s12 }
   0x8   :  { %31 = dma.hbm_to_vmem [thread:$0]  %s24_s8, 512, %s26_s12, [#allocation3], %s596_s9, %s596_s9, %s597_s10  }
   0x9   :  { %s53_s15 = sshll.u32 %s599_s2, 4  ;;  %s600_s16 = smov 64   ;;  %s54_s15 = int_to_ptr.vmem [resolvable:$true] %s53_s15 }
   0xa   :  { %s601_s17 = smov 4  }
   0xb   :  { %59 = dma.hbm_to_vmem [thread:$0]  %s52_s3, 1024, %s54_s15, [#allocation6], %s600_s16, %s600_s16, %s601_s17  }
   0xc   :  { %589 = dma.done.wait [#allocation3], 512  }
   0xd   :  { %590 = vsyncadd [#allocation3], 4294966784 }
   0xe   :  { %591 = dma.done.wait [#allocation6], 1536  }
   0xf   :  { %592 = vsyncadd [#allocation6], 4294965760  ;;  %v447_v0 = vld [vmem:[%s736_s4 + $0x38] sm:$0xff]  ;;  %v446_v1 = vld [vmem:[%s736_s4 + $0x30] sm:$0xff]  ;;  %v602_v20 = vmov 0   ;;  %s362_s27 = sshll.u32 %s739_s7, 4  ;;  %s363_s27 = int_to_ptr.hbm [resolvable:$true] %s362_s27 }
  0x10   :  { %148 = vmatpush.bf16.msra.mxu0 %v447_v0  ;;  %456 = vmatpush.bf16.msra.mxu2 %v447_v0  ;;  %v445_v2 = vld [vmem:[%s736_s4 + $0x28] sm:$0xff]  ;;  %v444_v3 = vld [vmem:[%s736_s4 + $0x20] sm:$0xff]  ;;  %v443_v4 = vld [vmem:[%s736_s4 + $0x18] sm:$0xff] }
  0x11   :  { %v442_v5 = vld [vmem:[%s736_s4 + $0x10] sm:$0xff]  ;;  %v441_v6 = vld [vmem:[%s736_s4 + $0x8] sm:$0xff]  ;;  %v440_v7 = vld [vmem:[%s736_s4] sm:$0xff]  ;;  %482 = vset.pattern.permute.xlu1 %v602_v20  ;;  %481 = vset.pattern.permute.xlu0 %v602_v20 }
  0x12   :  { %v683_v8 = vld [vmem:[#allocation2] sm:$0xff]  ;;  %v685_v9 = vld [vmem:[#allocation2 + $0x8] sm:$0xff]  ;;  %v687_v10 = vld [vmem:[#allocation2 + $0x10] sm:$0xff]  ;;  %483 = vset.pattern.permute.xlu2 %v602_v20 }
  0x13   :  { %v689_v11 = vld [vmem:[#allocation2 + $0x18] sm:$0xff]  ;;  %v78_v12 = vpack.c.bf16 %v685_v9, %v683_v8  ;;  %v454_v15 = vld [vmem:[#allocation7 + $0x30] sm:$0xff]  ;;  %v453_v16 = vld [vmem:[#allocation7 + $0x28] sm:$0xff] }
  0x14   :  { %149 = vmatpush.bf16.msra.mxu0 %v446_v1  ;;  %457 = vmatpush.bf16.msra.mxu2 %v446_v1  ;;  %v79_v13 = vpack.c.bf16 %v689_v11, %v687_v10  ;;  %v455_v14 = vld [vmem:[#allocation7 + $0x38] sm:$0xff]  ;;  %v452_v17 = vld [vmem:[#allocation7 + $0x20] sm:$0xff]  ;;  %v450_v19 = vld [vmem:[#allocation7 + $0x10] sm:$0xff] }
  0x15   :  { %273 = vmatpush.bf16.msra.mxu1 %v455_v14  ;;  %464 = vmatpush.bf16.msra.mxu3 %v455_v14  ;;  %v451_v18 = vld [vmem:[#allocation7 + $0x18] sm:$0xff]  ;;  %v449_v21 = vld [vmem:[#allocation7 + $0x8] sm:$0xff]  ;;  %v448_v22 = vld [vmem:[#allocation7] sm:$0xff] }
  0x16   :  { %v96_v23 = vld [vmem:[#allocation5] sm:$0xff]  ;;  %v98_v27 = vld [vmem:[#allocation5 + $0x10] sm:$0xff]  ;;  %v97_v32 = vld [vmem:[#allocation5 + $0x8] sm:$0xff] }
  0x17   :  { %v294_v28 = vld [vmem:[%s732_s0 + $0x10] sm:$0xff]  ;;  %v292_v29 = vld [vmem:[%s732_s0] sm:$0xff]  ;;  %v295_v39 = vld [vmem:[%s732_s0 + $0x18] sm:$0xff] }
  0x18   :  { %150 = vmatpush.bf16.msra.mxu0 %v445_v2  ;;  %458 = vmatpush.bf16.msra.mxu2 %v445_v2  ;;  %v293_v40 = vld [vmem:[%s732_s0 + $0x8] sm:$0xff]  ;;  %v320_v44 = vld [vmem:[%s733_s1] sm:$0xff]  ;;  %v99_v45 = vld [vmem:[#allocation5 + $0x18] sm:$0xff] }
  0x19   :  { %274 = vmatpush.bf16.msra.mxu1 %v454_v15  ;;  %465 = vmatpush.bf16.msra.mxu3 %v454_v15  ;;  %v321_v55 = vld [vmem:[%s733_s1 + $0x8] sm:$0xff]  ;;  %v323_v56 = vld [vmem:[%s733_s1 + $0x18] sm:$0xff]  ;;  %v322_v57 = vld [vmem:[%s733_s1 + $0x10] sm:$0xff] }
  0x1a   :  { %308 = vperm.xlu1 %482, %v294_v28   ;;  %298 = vperm.xlu0 %481, %v292_v29  }
  0x1b   :  { %326 = vperm.xlu2 %483, %v320_v44  }
  0x1c   :  { %151 = vmatpush.bf16.msra.mxu0 %v444_v3  ;;  %459 = vmatpush.bf16.msra.mxu2 %v444_v3 }
  0x1d   :  { %275 = vmatpush.bf16.msra.mxu1 %v453_v16  ;;  %466 = vmatpush.bf16.msra.mxu3 %v453_v16 }
  0x20   :  { %152 = vmatpush.bf16.msra.mxu0 %v443_v4  ;;  %460 = vmatpush.bf16.msra.mxu2 %v443_v4 }
  0x21   :  { %276 = vmatpush.bf16.msra.mxu1 %v452_v17  ;;  %467 = vmatpush.bf16.msra.mxu3 %v452_v17 }
  0x22   :  { %313 = vperm.xlu1 %482, %v295_v39   ;;  %303 = vperm.xlu0 %481, %v293_v40  }
  0x23   :  { %331 = vperm.xlu2 %483, %v321_v55  }
  0x24   :  { %153 = vmatpush.bf16.msra.mxu0 %v442_v5  ;;  %461 = vmatpush.bf16.msra.mxu2 %v442_v5 }
  0x25   :  { %277 = vmatpush.bf16.msra.mxu1 %v451_v18  ;;  %468 = vmatpush.bf16.msra.mxu3 %v451_v18 }
  0x28   :  { %154 = vmatpush.bf16.msra.mxu0 %v441_v6  ;;  %462 = vmatpush.bf16.msra.mxu2 %v441_v6 }
  0x29   :  { %278 = vmatpush.bf16.msra.mxu1 %v450_v19  ;;  %469 = vmatpush.bf16.msra.mxu3 %v450_v19 }
  0x2a   :  { %341 = vperm.xlu1 %482, %v323_v56   ;;  %336 = vperm.xlu0 %481, %v322_v57  }
  0x2c   :  { %155 = vmatpush.bf16.msra.mxu0 %v440_v7  ;;  %463 = vmatpush.bf16.msra.mxu2 %v440_v7 }
  0x2d   :  { %279 = vmatpush.bf16.msra.mxu1 %v449_v21  ;;  %470 = vmatpush.bf16.msra.mxu3 %v449_v21 }
  0x2f   :  { %156 = vmatmul.bf16.vlgmr.msra.gmra.mxu0 %v78_v12  ;;  %161 = vmatmul.bf16.vlgmr.msra.gmra.mxu2 %v79_v13 }
  0x31   :  { %280 = vmatpush.bf16.msra.mxu1 %v448_v22  ;;  %471 = vmatpush.bf16.msra.mxu3 %v448_v22  ;;  %v484_v22 = vld [vmem:[%s738_s6] ss:$0 sm:$0xff]  ;;  %s603_s6 = smov [#allocation8]  }
  0x32   :  { %s360_s24 = sshll.u32 %s603_s6, 4  ;;  %s361_s24 = int_to_ptr.vmem [resolvable:$true] %s360_s24 }
  0x8c   :  { %v299_v21 = vpop.permute.xlu0 %298 }
  0x94   :  { %v304_v29 = vpop.permute.xlu0 %303 }
  0x9c   :  { %v337_v40 = vpop.permute.xlu0 %336 }
  0xac   :  { %v157_v24 = vpop.f32.mrf.mxu0 }
  0xad   :  { %v158_v25 = vadd.f32 %v157_v24, %v96_v23  ;;  %v327_v23 = vpop.permute.xlu2 %326 }
  0xaf   :  { %v167_v26 = vmul.f32 %v158_v25, %v158_v25 }
  0xb1   :  { %v171_v30 = vmul.f32 %v167_v26, %v158_v25 }
  0xb2   :  { %v162_v31 = vpop.f32.mrf.mxu2 }
  0xb3   :  { %v175_v33 = vmul.f32 0.044715, %v171_v30  ;;  %v163_v34 = vadd.f32 %v162_v31, %v98_v27  ;;  %v309_v27 = vpop.permute.xlu1 %308 }
  0xb4   :  { %v159_v35 = vpop.f32.mrf.mxu0 }
  0xb5   :  { %v179_v36 = vadd.f32 %v175_v33, %v158_v25  ;;  %v169_v37 = vmul.f32 %v163_v34, %v163_v34  ;;  %v160_v38 = vadd.f32 %v159_v35, %v97_v32  ;;  %v332_v32 = vpop.permute.xlu2 %331 }
  0xb7   :  { %v173_v41 = vmul.f32 %v169_v37, %v163_v34  ;;  %v168_v42 = vmul.f32 %v160_v38, %v160_v38  ;;  %v183_v43 = vmul.f32 0.7978846, %v179_v36 }
  0xb9   :  { %v177_v46 = vmul.f32 0.044715, %v173_v41  ;;  %v172_v47 = vmul.f32 %v168_v42, %v160_v38  ;;  %485 = vtanh.f32 %v183_v43  ;;  %v318_v41 = vmul.f32 %v309_v27, %v687_v10 }
  0xba   :  { %v164_v48 = vpop.f32.mrf.mxu2 }
  0xbb   :  { %v181_v49 = vadd.f32 %v177_v46, %v163_v34  ;;  %v176_v50 = vmul.f32 0.044715, %v172_v47  ;;  %v165_v51 = vadd.f32 %v164_v48, %v99_v45  ;;  %v314_v36 = vpop.permute.xlu1 %313 }
  0xbd   :  { %v180_v52 = vadd.f32 %v176_v50, %v160_v38  ;;  %v170_v53 = vmul.f32 %v165_v51, %v165_v51  ;;  %v185_v54 = vmul.f32 0.7978846, %v181_v49 }
  0xbf   :  { %v174_v58 = vmul.f32 %v170_v53, %v165_v51  ;;  %v184_v59 = vmul.f32 0.7978846, %v180_v52  ;;  %487 = vtanh.f32 %v185_v54  ;;  %v486_v60 = vpop.eup %485 }
  0xc0   :  { %v191_v63 = vadd.f32 1.0, %v486_v60 }
  0xc1   :  { %v178_v61 = vmul.f32 0.044715, %v174_v58  ;;  %489 = vtanh.f32 %v184_v59 }
  0xc2   :  { %v195_v4 = vmul.f32 0.5, %v191_v63 }
  0xc3   :  { %v182_v62 = vadd.f32 %v178_v61, %v165_v51  ;;  %v342_v45 = vpop.permute.xlu1 %341 }
  0xc4   :  { %v199_v7 = vmul.f32 %v195_v4, %v158_v25  ;;  %v316_v25 = vmul.f32 %v299_v21, %v683_v8 }
  0xc5   :  { %v186_v0 = vmul.f32 0.7978846, %v182_v62  ;;  %v488_v1 = vpop.eup %487 }
  0xc6   :  { %v193_v6 = vadd.f32 1.0, %v488_v1 }
  0xc7   :  { %v490_v2 = vpop.eup %489  ;;  %491 = vtanh.f32 %v186_v0 }
  0xc8   :  { %v192_v3 = vadd.f32 1.0, %v490_v2  ;;  %v197_v16 = vmul.f32 0.5, %v193_v6 }
  0xca   :  { %v196_v5 = vmul.f32 0.5, %v192_v3  ;;  %v201_v18 = vmul.f32 %v197_v16, %v163_v34  ;;  %v317_v34 = vmul.f32 %v304_v29, %v685_v9  ;;  %v319_v9 = vmul.f32 %v314_v36, %v689_v11 }
  0xcc   :  { %v200_v12 = vmul.f32 %v196_v5, %v160_v38 }
  0xcd   :  { %v492_v13 = vpop.eup %491 }
  0xce   :  { %v203_v14 = vpack.c.bf16 %v200_v12, %v199_v7  ;;  %v194_v15 = vadd.f32 1.0, %v492_v13 }
  0xd0   :  { %281 = vmatmul.bf16.vlgmr.msra.gmra.mxu1 %v203_v14  ;;  %v198_v17 = vmul.f32 0.5, %v194_v15 }
  0xd2   :  { %v202_v19 = vmul.f32 %v198_v17, %v165_v51 }
  0xd4   :  { %v204_v20 = vpack.c.bf16 %v202_v19, %v201_v18 }
  0xd6   :  { %286 = vmatmul.bf16.vlgmr.msra.gmra.mxu3 %v204_v20 }
 0x14d   :  { %v282_v24 = vpop.f32.mrf.mxu1 }
 0x14e   :  { %v283_v26 = vadd.f32 %v484_v22, %v282_v24 }
 0x150   :  { %v344_v28 = vmul.f32 %v327_v23, %v283_v26 }
 0x152   :  { %v348_v30 = vadd.f32 %v344_v28, %v316_v25 }
 0x154   :  { %352 = vst [vmem:[#allocation8] sm:$0xff] %v348_v30 }
 0x155   :  { %v284_v31 = vpop.f32.mrf.mxu1 }
 0x156   :  { %v285_v33 = vadd.f32 %v484_v22, %v284_v31 }
 0x158   :  { %v345_v35 = vmul.f32 %v332_v32, %v285_v33 }
 0x159   :  { %v287_v37 = vpop.f32.mrf.mxu3 }
 0x15a   :  { %v349_v38 = vadd.f32 %v345_v35, %v317_v34  ;;  %v288_v39 = vadd.f32 %v484_v22, %v287_v37 }
 0x15c   :  { %353 = vst [vmem:[#allocation8 + $0x8] sm:$0xff] %v349_v38  ;;  %v346_v8 = vmul.f32 %v337_v40, %v288_v39 }
 0x15e   :  { %v350_v42 = vadd.f32 %v346_v8, %v318_v41 }
 0x160   :  { %354 = vst [vmem:[#allocation8 + $0x10] sm:$0xff] %v350_v42 }
 0x161   :  { %v289_v43 = vpop.f32.mrf.mxu3 }
 0x162   :  { %v290_v44 = vadd.f32 %v484_v22, %v289_v43 }
 0x164   :  { %v347_v46 = vmul.f32 %v342_v45, %v290_v44 }
 0x166   :  { %v351_v47 = vadd.f32 %v347_v46, %v319_v9 }
 0x168   :  { %355 = vst [vmem:[#allocation8 + $0x18] sm:$0xff] %v351_v47 }
 0x169   :  { %368 = dma.vmem_to_hbm [thread:$0]  %s361_s24, 512, %s363_s27, [#allocation4], %s596_s9, %s596_s9, %s597_s10  }
 0x16a   :  { %593 = dma.done.wait [#allocation4], 512  }
 0x16b   :  { %594 = vsyncadd [#allocation4], 4294966784 }
 0x16c   :  { %373 = vsyncpa [#allocation3], 1 }
 0x16d   :  { %374 = vsyncpa [#allocation6], 1 }
 0x16e   :  { %375 = vsyncpa [#allocation4], 1 }

</bundles_post_ra>
